<compile_context>
chip_gen: v6e
topology: v6e:2x2x1
jax: 0.10.0
libtpu: 0.0.40
codegen_flags: <defaults>
</compile_context>

<pallas_src>
import math

import jax
import jax.numpy as jnp
from jax.experimental import pallas as pl
from jax.experimental.pallas import tpu as pltpu

EPS = 1e-5  # PyTorch nn.LayerNorm default
_INV_SQRT2 = 1.0 / math.sqrt(2.0)


def _round_up(x: int, m: int) -> int:
    return ((x + m - 1) // m) * m


def _sublane(itemsize: int) -> int:
    # Sublane packing granularity: 8 rows for 32-bit, 16 for 16-bit dtypes.
    return 8 if itemsize >= 4 else 16


def _choose_tm(M: int, block_m: int, itemsize: int) -> int:
    sub = _sublane(itemsize)
    m_pad = _round_up(M, sub)
    if m_pad <= 2 * sub:
        return m_pad
    # At least 2 row tiles so dimension_semantics=("parallel",) actually
    # splits work across both v7x TensorCores.
    tm = min(block_m, _round_up(-(-M // 2), sub))
    # Prefer multiples of 256 (full 2x256 MXU passes on v6e/v7x) when large.
    if tm >= 256:
        tm = (tm // 256) * 256
    return max(tm, sub)


def _vmem_cap() -> int:
    phys = 0
    try:
        info = pltpu.get_tpu_info()
        phys = int(getattr(info, "vmem_capacity_bytes", 0) or 0)
    except Exception:
        phys = 0
    if not phys:
        phys = 64 * 1024 * 1024  # conservative: v7x per-TC VMEM
    # Leave headroom for compiler-internal scratch / semaphores.
    return max(int(phys * 0.85), 16 * 1024 * 1024)


def _layernorm_f32(x, g, b):
    mean = jnp.mean(x, axis=-1, keepdims=True)
    centered = x - mean
    var = jnp.mean(centered * centered, axis=-1, keepdims=True)
    return centered * jax.lax.rsqrt(var + EPS) * g + b


def _gelu_exact(h):
    # nn.GELU default (exact, erf-based).
    return 0.5 * h * (1.0 + jax.lax.erf(h * _INV_SQRT2))


def _ffn_kernel(x_ref, g_ref, b_ref, w1_ref, b1_ref, w2_ref, b2_ref, o_ref, h_ref):
    # LayerNorm in f32 (biased variance, eps=1e-5).
    xn = _layernorm_f32(x_ref[...].astype(jnp.float32), g_ref[...], b_ref[...])
    # Linear(dim -> hidden): MXU at the weights' dtype, f32 accumulation.
    h = jnp.dot(xn.astype(w1_ref.dtype), w1_ref[...],
                preferred_element_type=jnp.float32) + b1_ref[...]
    # GELU, staged in the second matmul's operand dtype (VMEM scratch).
    h_ref[...] = _gelu_exact(h).astype(h_ref.dtype)
    # Linear(hidden -> dim).
    y = jnp.dot(h_ref[...], w2_ref[...],
                preferred_element_type=jnp.float32) + b2_ref[...]
    o_ref[...] = y.astype(o_ref.dtype)


def _ffn_kernel_hchunk(x_ref, g_ref, b_ref, w1_ref, b1_ref, w2_ref, b2_ref, o_ref,
                       acc_ref, xn_ref):
    # grid = (row tiles [parallel], H chunks [arbitrary / reduction]).
    hi = pl.program_id(1)

    @pl.when(hi == 0)
    def _():
        acc_ref[...] = jnp.zeros_like(acc_ref)
        xn = _layernorm_f32(x_ref[...].astype(jnp.float32), g_ref[...], b_ref[...])
        xn_ref[...] = xn.astype(xn_ref.dtype)  # LayerNorm computed once per row tile

    h = jnp.dot(xn_ref[...], w1_ref[...],
                preferred_element_type=jnp.float32) + b1_ref[...]
    acc_ref[...] += jnp.dot(_gelu_exact(h).astype(w2_ref.dtype), w2_ref[...],
                            preferred_element_type=jnp.float32)

    @pl.when(hi == pl.num_programs(1) - 1)
    def _():
        o_ref[...] = (acc_ref[...] + b2_ref[...]).astype(o_ref.dtype)


def feed_forward(x, gamma, beta, w1, b1, w2, b2, *, block_m=512, block_h=512,
                 h_chunked=None):
    """FeedForward: LayerNorm(dim) -> Linear(dim, hidden) -> GELU -> Linear(hidden, dim).

    x: (B, S, D); gamma/beta: (D,); w1: (D, H); b1: (H,); w2: (H, D); b2: (D,).
    x / w1 / w2 may be f32 or bf16 (bf16 weights hit the MXU's bf16 rate); the
    LayerNorm/GELU elementwise math always runs in f32 with f32 accumulation.
    """
    B, S, D = x.shape
    H = w1.shape[1]
    M = B * S
    out_dtype = x.dtype

    x_isize = jnp.dtype(x.dtype).itemsize
    out_isize = jnp.dtype(out_dtype).itemsize
    w1_isize = jnp.dtype(w1.dtype).itemsize
    w2_isize = jnp.dtype(w2.dtype).itemsize

    TM = _choose_tm(M, block_m, x_isize)
    cap = _vmem_cap()
    small_bytes = 4 * (3 * D + H)  # gamma, beta, b2 (f32, D) + b1 (f32, H)

    def mono_bytes(tm):
        # Weights single-buffered (Buffered(1)); x/out tiles double-buffered;
        # (tm, H) GELU staging scratch in w2's dtype.
        return int(1.15 * (D * H * w1_isize + H * D * w2_isize + small_bytes
                           + 2 * tm * D * x_isize + 2 * tm * D * out_isize
                           + tm * H * w2_isize)) + (1 << 20)

    use_hchunk = h_chunked
    if use_hchunk is None:
        if mono_bytes(TM) <= cap:
            use_hchunk = False
        elif TM > 256 and mono_bytes(256) <= cap:
            TM, use_hchunk = 256, False        # shrink row tile before chunking H
        else:
            use_hchunk = H > 256               # fall back to H-chunked accumulation

    Mp = _round_up(M, TM)
    x2 = x.reshape(M, D)
    if Mp != M:
        x2 = jnp.pad(x2, ((0, Mp - M), (0, 0)))

    # Small params in f32 (v5e VPU has no bf16; cost negligible).
    g2 = gamma.reshape(1, D).astype(jnp.float32)
    be2 = beta.reshape(1, D).astype(jnp.float32)
    b1_2 = b1.reshape(1, H).astype(jnp.float32)
    b2_2 = b2.reshape(1, D).astype(jnp.float32)

    if not use_hchunk:
        vmem_limit = max(min(mono_bytes(TM), cap), 16 * 1024 * 1024)
        cost = pl.CostEstimate(
            flops=4 * Mp * D * H,
            transcendentals=Mp * H,
            bytes_accessed=Mp * D * (x_isize + out_isize)
                           + D * H * w1_isize + H * D * w2_isize + small_bytes,
        )
        out = pl.pallas_call(
            _ffn_kernel,
            out_shape=jax.ShapeDtypeStruct((Mp, D), out_dtype),
            grid=(Mp // TM,),
            in_specs=[
                pl.BlockSpec((TM, D), lambda i: (i, 0)),  # x tile (double-buffered)
                pl.BlockSpec((1, D), lambda i: (0, 0), pipeline_mode=pl.Buffered(1)),  # gamma
                pl.BlockSpec((1, D), lambda i: (0, 0), pipeline_mode=pl.Buffered(1)),  # beta
                pl.BlockSpec((D, H), lambda i: (0, 0), pipeline_mode=pl.Buffered(1)),  # w1
                pl.BlockSpec((1, H), lambda i: (0, 0), pipeline_mode=pl.Buffered(1)),  # b1
                pl.BlockSpec((H, D), lambda i: (0, 0), pipeline_mode=pl.Buffered(1)),  # w2
                pl.BlockSpec((1, D), lambda i: (0, 0), pipeline_mode=pl.Buffered(1)),  # b2
            ],
            out_specs=pl.BlockSpec((TM, D), lambda i: (i, 0)),
            scratch_shapes=[pltpu.VMEM((TM, H), w2.dtype)],
            compiler_params=pltpu.CompilerParams(
                dimension_semantics=("parallel",),
                vmem_limit_bytes=int(vmem_limit),
            ),
            cost_estimate=cost,
        )(x2, g2, be2, w1, b1_2, w2, b2_2)
        return out[:M].reshape(B, S, D)

    # ---- H-chunked path: stream (D, TH)/(TH, D) weight chunks, accumulate. ----
    TH = min(_round_up(min(block_h, H), 128), _round_up(H, 128))
    Hp = _round_up(H, TH)
    w1p, b1p, w2p = w1, b1_2, w2
    if Hp != H:
        # Zero-padding H is exact: b1 pad = 0 -> GELU(0) = 0 -> contributes 0.
        w1p = jnp.pad(w1, ((0, 0), (0, Hp - H)))
        b1p = jnp.pad(b1_2, ((0, 0), (0, Hp - H)))
        w2p = jnp.pad(w2, ((0, Hp - H), (0, 0)))

    hbytes = int(1.15 * (2 * (D * TH * w1_isize + TH * D * w2_isize + 4 * TH)
                         + 4 * 3 * D
                         + 2 * TM * D * x_isize + 2 * TM * D * out_isize
                         + TM * D * 4 + TM * D * w1_isize)) + (1 << 20)
    vmem_limit = max(min(hbytes, cap), 16 * 1024 * 1024)
    cost = pl.CostEstimate(
        flops=4 * Mp * D * Hp,
        transcendentals=Mp * Hp,
        bytes_accessed=Mp * D * (x_isize + out_isize)
                       + (Mp // TM) * (D * Hp * w1_isize + Hp * D * w2_isize)
                       + small_bytes,
    )
    out = pl.pallas_call(
        _ffn_kernel_hchunk,
        out_shape=jax.ShapeDtypeStruct((Mp, D), out_dtype),
        grid=(Mp // TM, Hp // TH),
        in_specs=[
            pl.BlockSpec((TM, D), lambda i, k: (i, 0)),   # x tile
            pl.BlockSpec((1, D), lambda i, k: (0, 0), pipeline_mode=pl.Buffered(1)),  # gamma
            pl.BlockSpec((1, D), lambda i, k: (0, 0), pipeline_mode=pl.Buffered(1)),  # beta
            pl.BlockSpec((D, TH), lambda i, k: (0, k)),   # w1 chunk (double-buffered)
            pl.BlockSpec((1, TH), lambda i, k: (0, k)),   # b1 chunk
            pl.BlockSpec((TH, D), lambda i, k: (k, 0)),   # w2 chunk (double-buffered)
            pl.BlockSpec((1, D), lambda i, k: (0, 0), pipeline_mode=pl.Buffered(1)),  # b2
        ],
        out_specs=pl.BlockSpec((TM, D), lambda i, k: (i, 0)),
        scratch_shapes=[pltpu.VMEM((TM, D), jnp.float32),  # f32 output accumulator
                        pltpu.VMEM((TM, D), w1.dtype)],    # LayerNorm result (reused per chunk)
        compiler_params=pltpu.CompilerParams(
            dimension_semantics=("parallel", "arbitrary"),
            vmem_limit_bytes=int(vmem_limit),
        ),
        cost_estimate=cost,
    )(x2, g2, be2, w1p, b1p, w2p, b2_2)
    return out[:M].reshape(B, S, D)


def reference(x, gamma, beta, w1, b1, w2, b2):
    xf = x.astype(jnp.float32)
    mean = jnp.mean(xf, axis=-1, keepdims=True)
    var = jnp.mean((xf - mean) ** 2, axis=-1, keepdims=True)
    xn = (xf - mean) / jnp.sqrt(var + EPS) * gamma.astype(jnp.float32) + beta.astype(jnp.float32)
    h = jnp.dot(xn, w1.astype(jnp.float32), precision=jax.lax.Precision.HIGHEST) + b1.astype(jnp.float32)
    h = 0.5 * h * (1.0 + jax.lax.erf(h * _INV_SQRT2))
    y = jnp.dot(h, w2.astype(jnp.float32), precision=jax.lax.Precision.HIGHEST) + b2.astype(jnp.float32)
    return y.astype(x.dtype)


if __name__ == "__main__":
    # Small but lane-aligned dims (D, H multiples of 128) so stores are lane-dense.
    B, S, D, Hdim = 2, 8, 128, 256

    key = jax.random.PRNGKey(0)
    kx, kg, kb, k1, k2, k3, k4 = jax.random.split(key, 7)

    x = jax.random.normal(kx, (B, S, D), dtype=jnp.float32)
    gamma = 1.0 + 0.1 * jax.random.normal(kg, (D,), jnp.float32)
    beta = 0.05 * jax.random.normal(kb, (D,), jnp.float32)
    w1 = jax.random.normal(k1, (D, Hdim), jnp.float32) * (1.0 / math.sqrt(D))
    b1 = jax.random.normal(k2, (Hdim,), jnp.float32) * 0.01
    w2 = jax.random.normal(k3, (Hdim, D), jnp.float32) * (1.0 / math.sqrt(Hdim))
    b2 = jax.random.normal(k4, (D,), jnp.float32) * 0.01

    y_ref = reference(x, gamma, beta, w1, b1, w2, b2)

    # f32 monolithic path: should match the f32 reference closely.
    y = feed_forward(x, gamma, beta, w1, b1, w2, b2)
    y = jax.block_until_ready(y)
    assert y.shape == (B, S, D)
    assert jnp.allclose(y, y_ref, atol=2e-3, rtol=2e-3), "mono path mismatch vs f32 reference"

    # H-chunked accumulation path (auto-selected when VMEM is tight; forced here to test).
    y_h = feed_forward(x, gamma, beta, w1, b1, w2, b2, block_h=128, h_chunked=True)
    y_h = jax.block_until_ready(y_h)
    assert jnp.allclose(y_h, y_ref, atol=2e-3, rtol=2e-3), "H-chunked path mismatch vs f32 reference"

    # bf16 path (bf16 MXU operands, f32 accumulation): different precision contract,
    # just verify it compiles, runs and produces finite values of the right shape.
    xb = x.astype(jnp.bfloat16)
    yb = feed_forward(xb, gamma, beta, w1.astype(jnp.bfloat16), b1, w2.astype(jnp.bfloat16), b2)
    yb = jax.block_until_ready(yb)
    assert yb.shape == (B, S, D)
    assert bool(jnp.all(jnp.isfinite(yb.astype(jnp.float32))))

    print("KERNEL_OK")
</pallas_src>

<mosaic_0001>
module attributes {stable_mosaic.version = 11 : i64} {
  func.func @_ffn_kernel(%arg0: i32, %arg1: memref<16x128xf32, #tpu.memory_space<vmem>>, %arg2: memref<1x128xf32, #tpu.memory_space<vmem>>, %arg3: memref<1x128xf32, #tpu.memory_space<vmem>>, %arg4: memref<128x256xf32, #tpu.memory_space<vmem>>, %arg5: memref<1x256xf32, #tpu.memory_space<vmem>>, %arg6: memref<256x128xf32, #tpu.memory_space<vmem>>, %arg7: memref<1x128xf32, #tpu.memory_space<vmem>>, %arg8: memref<16x128xf32, #tpu.memory_space<vmem>>, %arg9: memref<16x256xf32, #tpu.memory_space<vmem>>) attributes {dimension_semantics = [#tpu.dimension_semantics<parallel>], iteration_bounds = array<i64: 1>, scalar_prefetch = 0 : i64, scratch_operands = 1 : i64, tpu.core_type = #tpu.core_type<tc>, window_params = [{transform_indices = @transform_0, window_bounds = array<i64: 16, 128>}, {pipeline_mode = #tpu.pipeline_mode<synchronous>, transform_indices = @transform_1, window_bounds = array<i64: 1, 128>}, {pipeline_mode = #tpu.pipeline_mode<synchronous>, transform_indices = @transform_2, window_bounds = array<i64: 1, 128>}, {pipeline_mode = #tpu.pipeline_mode<synchronous>, transform_indices = @transform_3, window_bounds = array<i64: 128, 256>}, {pipeline_mode = #tpu.pipeline_mode<synchronous>, transform_indices = @transform_4, window_bounds = array<i64: 1, 256>}, {pipeline_mode = #tpu.pipeline_mode<synchronous>, transform_indices = @transform_5, window_bounds = array<i64: 256, 128>}, {pipeline_mode = #tpu.pipeline_mode<synchronous>, transform_indices = @transform_6, window_bounds = array<i64: 1, 128>}, {transform_indices = @transform_7, window_bounds = array<i64: 16, 128>}]} {
    %c0 = arith.constant 0 : index
    %c0_0 = arith.constant 0 : index
    %0 = vector.load %arg1[%c0, %c0_0] : memref<16x128xf32, #tpu.memory_space<vmem>>, vector<16x128xf32>
    %c0_1 = arith.constant 0 : index
    %c0_2 = arith.constant 0 : index
    %1 = vector.load %arg2[%c0_1, %c0_2] : memref<1x128xf32, #tpu.memory_space<vmem>>, vector<1x128xf32>
    %c0_3 = arith.constant 0 : index
    %c0_4 = arith.constant 0 : index
    %2 = vector.load %arg3[%c0_3, %c0_4] : memref<1x128xf32, #tpu.memory_space<vmem>>, vector<1x128xf32>
    %cst = arith.constant dense<0.000000e+00> : vector<16xf32>
    %3 = vector.multi_reduction <add>, %0, %cst [1] : vector<16x128xf32> to vector<16xf32>
    %4 = vector.shape_cast %3 : vector<16xf32> to vector<16x1xf32>
    %cst_5 = arith.constant 1.280000e+02 : f32
    %5 = vector.broadcast %cst_5 : f32 to vector<16x1xf32>
    %6 = arith.divf %4, %5 : vector<16x1xf32>
    %7 = vector.broadcast %6 : vector<16x1xf32> to vector<16x128xf32>
    %8 = arith.subf %0, %7 : vector<16x128xf32>
    %9 = arith.mulf %8, %8 : vector<16x128xf32>
    %cst_6 = arith.constant dense<0.000000e+00> : vector<16xf32>
    %10 = vector.multi_reduction <add>, %9, %cst_6 [1] : vector<16x128xf32> to vector<16xf32>
    %11 = vector.shape_cast %10 : vector<16xf32> to vector<16x1xf32>
    %cst_7 = arith.constant 1.280000e+02 : f32
    %12 = vector.broadcast %cst_7 : f32 to vector<16x1xf32>
    %13 = arith.divf %11, %12 : vector<16x1xf32>
    %cst_8 = arith.constant 9.99999974E-6 : f32
    %14 = vector.broadcast %cst_8 : f32 to vector<16x1xf32>
    %15 = arith.addf %13, %14 : vector<16x1xf32>
    %16 = math.rsqrt %15 : vector<16x1xf32>
    %17 = vector.broadcast %16 : vector<16x1xf32> to vector<16x128xf32>
    %18 = arith.mulf %8, %17 : vector<16x128xf32>
    %19 = vector.broadcast %1 : vector<1x128xf32> to vector<16x128xf32>
    %20 = arith.mulf %18, %19 : vector<16x128xf32>
    %21 = vector.broadcast %2 : vector<1x128xf32> to vector<16x128xf32>
    %22 = arith.addf %20, %21 : vector<16x128xf32>
    %c0_9 = arith.constant 0 : index
    %c0_10 = arith.constant 0 : index
    %23 = vector.load %arg4[%c0_9, %c0_10] : memref<128x256xf32, #tpu.memory_space<vmem>>, vector<128x256xf32>
    %cst_11 = arith.constant dense<0.000000e+00> : vector<16x256xf32>
    %24 = tpu.matmul %22, %23, %cst_11 {dimension_numbers = #tpu.dot_dimension_numbers<[1], [0], [0], [1], [0, 0, 1, 1], [], []>} : vector<16x128xf32>, vector<128x256xf32>, vector<16x256xf32> -> vector<16x256xf32>
    %c0_12 = arith.constant 0 : index
    %c0_13 = arith.constant 0 : index
    %25 = vector.load %arg5[%c0_12, %c0_13] : memref<1x256xf32, #tpu.memory_space<vmem>>, vector<1x256xf32>
    %26 = vector.broadcast %25 : vector<1x256xf32> to vector<16x256xf32>
    %27 = arith.addf %24, %26 : vector<16x256xf32>
    %cst_14 = arith.constant 5.000000e-01 : f32
    %28 = vector.broadcast %cst_14 : f32 to vector<16x256xf32>
    %29 = arith.mulf %28, %27 : vector<16x256xf32>
    %cst_15 = arith.constant 0.707106769 : f32
    %30 = vector.broadcast %cst_15 : f32 to vector<16x256xf32>
    %31 = arith.mulf %27, %30 : vector<16x256xf32>
    %32 = math.erf %31 : vector<16x256xf32>
    %cst_16 = arith.constant 1.000000e+00 : f32
    %33 = vector.broadcast %cst_16 : f32 to vector<16x256xf32>
    %34 = arith.addf %33, %32 : vector<16x256xf32>
    %35 = arith.mulf %29, %34 : vector<16x256xf32>
    %c0_17 = arith.constant 0 : index
    %c0_18 = arith.constant 0 : index
    %36 = vector.load %arg9[%c0_17, %c0_18] : memref<16x256xf32, #tpu.memory_space<vmem>>, vector<16x256xf32>
    tpu.vector_store %arg9[%c0_17, %c0_18], %35 {strides = array<i32>} : memref<16x256xf32, #tpu.memory_space<vmem>>, vector<16x256xf32>,
    %c0_19 = arith.constant 0 : index
    %c0_20 = arith.constant 0 : index
    %37 = vector.load %arg9[%c0_19, %c0_20] : memref<16x256xf32, #tpu.memory_space<vmem>>, vector<16x256xf32>
    %c0_21 = arith.constant 0 : index
    %c0_22 = arith.constant 0 : index
    %38 = vector.load %arg6[%c0_21, %c0_22] : memref<256x128xf32, #tpu.memory_space<vmem>>, vector<256x128xf32>
    %cst_23 = arith.constant dense<0.000000e+00> : vector<16x128xf32>
    %39 = tpu.matmul %37, %38, %cst_23 {dimension_numbers = #tpu.dot_dimension_numbers<[1], [0], [0], [1], [0, 0, 1, 1], [], []>} : vector<16x256xf32>, vector<256x128xf32>, vector<16x128xf32> -> vector<16x128xf32>
    %c0_24 = arith.constant 0 : index
    %c0_25 = arith.constant 0 : index
    %40 = vector.load %arg7[%c0_24, %c0_25] : memref<1x128xf32, #tpu.memory_space<vmem>>, vector<1x128xf32>
    %41 = vector.broadcast %40 : vector<1x128xf32> to vector<16x128xf32>
    %42 = arith.addf %39, %41 : vector<16x128xf32>
    %c0_26 = arith.constant 0 : index
    %c0_27 = arith.constant 0 : index
    %43 = vector.load %arg8[%c0_26, %c0_27] : memref<16x128xf32, #tpu.memory_space<vmem>>, vector<16x128xf32>
    tpu.vector_store %arg8[%c0_26, %c0_27], %42 {strides = array<i32>} : memref<16x128xf32, #tpu.memory_space<vmem>>, vector<16x128xf32>,
    return
  }
  func.func @transform_0(%arg0: i32) -> (i32, i32) {
    %c0_i32 = arith.constant 0 : i32
    %c0_i32_0 = arith.constant 0 : i32
    return %arg0, %c0_i32 : i32, i32
  }
  func.func @transform_1(%arg0: i32) -> (i32, i32) {
    %c0_i32 = arith.constant 0 : i32
    %c0_i32_0 = arith.constant 0 : i32
    %c0_i32_1 = arith.constant 0 : i32
    return %c0_i32, %c0_i32_0 : i32, i32
  }
  func.func @transform_2(%arg0: i32) -> (i32, i32) {
    %c0_i32 = arith.constant 0 : i32
    %c0_i32_0 = arith.constant 0 : i32
    %c0_i32_1 = arith.constant 0 : i32
    return %c0_i32, %c0_i32_0 : i32, i32
  }
  func.func @transform_3(%arg0: i32) -> (i32, i32) {
    %c0_i32 = arith.constant 0 : i32
    %c0_i32_0 = arith.constant 0 : i32
    %c0_i32_1 = arith.constant 0 : i32
    return %c0_i32, %c0_i32_0 : i32, i32
  }
  func.func @transform_4(%arg0: i32) -> (i32, i32) {
    %c0_i32 = arith.constant 0 : i32
    %c0_i32_0 = arith.constant 0 : i32
    %c0_i32_1 = arith.constant 0 : i32
    return %c0_i32, %c0_i32_0 : i32, i32
  }
  func.func @transform_5(%arg0: i32) -> (i32, i32) {
    %c0_i32 = arith.constant 0 : i32
    %c0_i32_0 = arith.constant 0 : i32
    %c0_i32_1 = arith.constant 0 : i32
    return %c0_i32, %c0_i32_0 : i32, i32
  }
  func.func @transform_6(%arg0: i32) -> (i32, i32) {
    %c0_i32 = arith.constant 0 : i32
    %c0_i32_0 = arith.constant 0 : i32
    %c0_i32_1 = arith.constant 0 : i32
    return %c0_i32, %c0_i32_0 : i32, i32
  }
  func.func @transform_7(%arg0: i32) -> (i32, i32) {
    %c0_i32 = arith.constant 0 : i32
    %c0_i32_0 = arith.constant 0 : i32
    return %arg0, %c0_i32 : i32, i32
  }
}

</mosaic_0001>

<bundles_post_ra>
// kernel: tpu_custom_call.1
= control target key start
LH: loop header
LB: loop body
LE: loop exit
PB: predicated region body
PF: predicated region fallthrough
CT: control target
= control target key end

     0   :  { %12 = vsyncpa [#allocation4], 0  ;;  %s671_s0 = inlined_call_operand.hbm [shape: f32[16,128], index: 0, kind: input, shape index: {}]   ;;  %s672_s1 = inlined_call_operand.vmem [shape: f32[1,128], index: 1, kind: input, shape index: {}]   ;;  %s673_s2 = inlined_call_operand.hbm [shape: f32[1,128], index: 2, kind: input, shape index: {}]   ;;  %s674_s3 = inlined_call_operand.hbm [shape: f32[128,256], index: 3, kind: input, shape index: {}]   ;;  %s675_s4 = inlined_call_operand.vmem [shape: f32[1,256], index: 4, kind: input, shape index: {}]   ;;  %s676_s5 = inlined_call_operand.hbm [shape: f32[256,128], index: 5, kind: input, shape index: {}]   ;;  %s677_s6 = inlined_call_operand.vmem [shape: f32[1,128], index: 6, kind: input, shape index: {}]   ;;  %s678_s7 = inlined_call_operand.hbm [shape: f32[16,128], index: 7, kind: output, shape index: {}]  }
   0x1   :  { %13 = vsyncpa [#allocation7], 0 }
   0x2   :  { %14 = vsyncpa [#allocation10], 0 }
   0x3   :  { %15 = vsyncpa [#allocation5], 0  ;;  %s578_s24 = smov [#allocation6]   ;;  %s579_s26 = smov [#allocation3]  }
   0x4   :  { %s36_s25 = sshll.u32 %s578_s24, 4  ;;  %s21_s27 = sshll.u32 %s579_s26, 4  ;;  %s37_s25 = int_to_ptr.vmem [resolvable:$true] %s36_s25  ;;  %s22_s27 = int_to_ptr.vmem [resolvable:$true] %s21_s27 }
   0x5   :  { %s478_s28 = scalar_lea.vmem %s37_s25, 16  ;;  %s482_s29 = scalar_lea.vmem %s37_s25, 32 }
   0x6   :  { %p479_p0 = scmp.ne.s32.totalorder %s37_s25, %s478_s28  ;;  %p483_p1 = scmp.lt.s32.totalorder %s37_s25, %s37_s25 }
   0x7   :  { %p484_p2 = scmp.lt.s32.totalorder %s482_s29, %s478_s28 }
   0x9   :  { %p485_p3 = por %p484_p2, %p483_p1 }
   0xb   :  { %p486_p4 = pnand %p485_p3, %p479_p0 }
   0xd   :  { %489 = shalt.err (!%p486_p4)
}
   0xe   :  { %39 = dma.hbm_to_vmem [thread:$0]  %s673_s2, 16, %s37_s25, [#allocation7]  }
   0xf   :  { %s498_s9 = scalar_lea.vmem %s22_s27, 256  ;;  %p503_p6 = scmp.lt.s32.totalorder %s22_s27, %s22_s27 }
  0x10   :  { %p499_p5 = scmp.ne.s32.totalorder %s22_s27, %s498_s9  ;;  %p504_p7 = scmp.lt.s32.totalorder %s498_s9, %s498_s9 }
  0x12   :  { %p505_p8 = por %p504_p7, %p503_p6 }
  0x14   :  { %p506_p9 = pnand %p505_p8, %p499_p5 }
  0x16   :  { %509 = shalt.err (!%p506_p9)
}
  0x17   :  { %s580_s10 = smov 128   ;;  %s581_s11 = smov 8  }
  0x18   :  { %27 = dma.hbm_to_vmem [thread:$0]  %s671_s0, 256, %s22_s27, [#allocation4], %s580_s10, %s580_s10, %s581_s11  }
  0x19   :  { %s582_s14 = smov [#allocation8]  }
  0x1a   :  { %s45_s15 = sshll.u32 %s582_s14, 4  ;;  %s46_s15 = int_to_ptr.vmem [resolvable:$true] %s45_s15 }
  0x1b   :  { %s518_s2 = scalar_lea.vmem %s46_s15, 4096  ;;  %p523_p11 = scmp.lt.s32.totalorder %s46_s15, %s46_s15 }
  0x1c   :  { %p519_p10 = scmp.ne.s32.totalorder %s46_s15, %s518_s2  ;;  %p524_p12 = scmp.lt.s32.totalorder %s518_s2, %s518_s2 }
  0x1e   :  { %p525_p13 = por %p524_p12, %p523_p11 }
  0x20   :  { %p526_p0 = pnand %p525_p13, %p519_p10 }
  0x22   :  { %529 = shalt.err (!%p526_p0)
}
  0x23   :  { %s583_s16 = smov 256   ;;  %s584_s17 = smov 16  }
  0x24   :  { %51 = dma.hbm_to_vmem [thread:$0]  %s674_s3, 4096, %s46_s15, [#allocation7], %s583_s16, %s583_s16, %s584_s17  }
  0x25   :  { %s585_s20 = smov [#allocation9]  }
  0x26   :  { %s59_s21 = sshll.u32 %s585_s20, 4  ;;  %s60_s21 = int_to_ptr.vmem [resolvable:$true] %s59_s21 }
  0x27   :  { %s538_s0 = scalar_lea.vmem %s60_s21, 4096  ;;  %p543_p2 = scmp.lt.s32.totalorder %s60_s21, %s60_s21 }
  0x28   :  { %p539_p1 = scmp.ne.s32.totalorder %s60_s21, %s538_s0  ;;  %p544_p3 = scmp.lt.s32.totalorder %s538_s0, %s538_s0 }
  0x2a   :  { %p545_p4 = por %p544_p3, %p543_p2 }
  0x2c   :  { %p546_p5 = pnand %p545_p4, %p539_p1 }
  0x2e   :  { %549 = shalt.err (!%p546_p5)
}
  0x2f   :  { %65 = dma.hbm_to_vmem [thread:$0]  %s676_s5, 4096, %s60_s21, [#allocation10], %s580_s10, %s580_s10, %s581_s11  }
  0x30   :  { %570 = dma.done.wait [#allocation4], 256  }
  0x31   :  { %571 = vsyncadd [#allocation4], 4294967040 }
  0x32   :  { %572 = dma.done.wait [#allocation7], 4112  }
  0x33   :  { %573 = vsyncadd [#allocation7], 4294963184 }
  0x34   :  { %574 = dma.done.wait [#allocation10], 4096  }
  0x35   :  { %575 = vsyncadd [#allocation10], 4294963200  ;;  %v80_v0 = vld [vmem:[#allocation3] sm:$0xff]  ;;  %v81_v1 = vld [vmem:[#allocation3 + $0x8] sm:$0xff]  ;;  %v586_v31 = vmov 0.0   ;;  %s587_s26 = smov [#allocation11]  }
  0x36   :  { %84 = vadd.xlane.f32.xlu0 %v80_v0  ;;  %v154_v2 = vld [vmem:[#allocation8 + $0xf8] sm:$0xff]  ;;  %v153_v3 = vld [vmem:[#allocation8 + $0xf0] sm:$0xff]  ;;  %v152_v4 = vld [vmem:[#allocation8 + $0xe8] sm:$0xff]  ;;  %231 = vmatprep.mubr.f32.mxu0 %v586_v31  ;;  %s393_s27 = sshll.u32 %s587_s26, 4  ;;  %s394_s27 = int_to_ptr.vmem [resolvable:$true] %s393_s27 }
  0x37   :  { %167 = vmatprep.subr.mxu0 %v154_v2  ;;  %v151_v5 = vld [vmem:[#allocation8 + $0xe0] sm:$0xff]  ;;  %v150_v6 = vld [vmem:[#allocation8 + $0xd8] sm:$0xff]  ;;  %v149_v7 = vld [vmem:[#allocation8 + $0xd0] sm:$0xff]  ;;  %s550_s28 = scalar_lea.vmem %s394_s27, 256  ;;  %p555_p7 = scmp.lt.s32.totalorder %s394_s27, %s394_s27 }
  0x38   :  { %168 = vmatpush1.msra.mxu0 %v153_v3  ;;  %v148_v8 = vld [vmem:[#allocation8 + $0xc8] sm:$0xff]  ;;  %v147_v9 = vld [vmem:[#allocation8 + $0xc0] sm:$0xff]  ;;  %v146_v18 = vld [vmem:[#allocation8 + $0xb8] sm:$0xff]  ;;  %p551_p6 = scmp.ne.s32.totalorder %s394_s27, %s550_s28  ;;  %p556_p8 = scmp.lt.s32.totalorder %s550_s28, %s550_s28 }
  0x39   :  { %169 = vmatprep.subr.mxu0 %v152_v4  ;;  %v145_v19 = vld [vmem:[#allocation8 + $0xb0] sm:$0xff]  ;;  %v144_v20 = vld [vmem:[#allocation8 + $0xa8] sm:$0xff]  ;;  %v143_v21 = vld [vmem:[#allocation8 + $0xa0] sm:$0xff] }
  0x3a   :  { %86 = vadd.xlane.f32.xlu0 %v81_v1  ;;  %170 = vmatpush1.msra.mxu0 %v151_v5  ;;  %v142_v22 = vld [vmem:[#allocation8 + $0x98] sm:$0xff]  ;;  %v141_v23 = vld [vmem:[#allocation8 + $0x90] sm:$0xff]  ;;  %v140_v24 = vld [vmem:[#allocation8 + $0x88] sm:$0xff]  ;;  %p557_p9 = por %p556_p8, %p555_p7 }
  0x3b   :  { %171 = vmatprep.subr.mxu0 %v150_v6  ;;  %v139_v25 = vld [vmem:[#allocation8 + $0x80] sm:$0xff]  ;;  %v138_v26 = vld [vmem:[#allocation8 + $0x78] sm:$0xff]  ;;  %v137_v27 = vld [vmem:[#allocation8 + $0x70] sm:$0xff] }
  0x3c   :  { %172 = vmatpush1.msra.mxu0 %v149_v7  ;;  %v136_v28 = vld [vmem:[#allocation8 + $0x68] sm:$0xff]  ;;  %v135_v29 = vld [vmem:[#allocation8 + $0x60] sm:$0xff]  ;;  %v134_v30 = vld [vmem:[#allocation8 + $0x58] sm:$0xff]  ;;  %p558_p10 = pnand %p557_p9, %p551_p6 }
  0x3d   :  { %173 = vmatprep.subr.mxu0 %v148_v8  ;;  %v133_v32 = vld [vmem:[#allocation8 + $0x50] sm:$0xff]  ;;  %v132_v33 = vld [vmem:[#allocation8 + $0x48] sm:$0xff]  ;;  %v131_v34 = vld [vmem:[#allocation8 + $0x40] sm:$0xff] }
  0x3e   :  { %174 = vmatpush1.msra.mxu0 %v147_v9  ;;  %v130_v35 = vld [vmem:[#allocation8 + $0x38] sm:$0xff]  ;;  %v129_v36 = vld [vmem:[#allocation8 + $0x30] sm:$0xff]  ;;  %v128_v37 = vld [vmem:[#allocation8 + $0x28] sm:$0xff] }
  0x3f   :  { %175 = vmatprep.subr.mxu0 %v146_v18  ;;  %v127_v38 = vld [vmem:[#allocation8 + $0x20] sm:$0xff]  ;;  %v126_v39 = vld [vmem:[#allocation8 + $0x18] sm:$0xff]  ;;  %v125_v40 = vld [vmem:[#allocation8 + $0x10] sm:$0xff] }
  0x40   :  { %176 = vmatpush1.msra.mxu0 %v145_v19  ;;  %v124_v41 = vld [vmem:[#allocation8 + $0x8] sm:$0xff]  ;;  %v123_v42 = vld [vmem:[#allocation8] sm:$0xff]  ;;  %v303_v43 = vld [vmem:[#allocation9 + $0xf8] sm:$0xff] }
  0x41   :  { %177 = vmatprep.subr.mxu0 %v144_v20  ;;  %v287_v44 = vld [vmem:[#allocation9 + $0x78] sm:$0xff]  ;;  %v302_v45 = vld [vmem:[#allocation9 + $0xf0] sm:$0xff]  ;;  %410 = vmatprep.subr.mxu1 %v303_v43  ;;  %v301_v47 = vld [vmem:[#allocation9 + $0xe8] sm:$0xff] }
  0x42   :  { %178 = vmatpush1.msra.mxu0 %v143_v21  ;;  %v286_v46 = vld [vmem:[#allocation9 + $0x70] sm:$0xff]  ;;  %411 = vmatpush3.msra.mxu1 %v287_v44  ;;  %v285_v48 = vld [vmem:[#allocation9 + $0x68] sm:$0xff]  ;;  %v408_v58 = vld [vmem:[#allocation6] ss:$0 sm:$0xff] }
  0x43   :  { %179 = vmatprep.subr.mxu0 %v142_v22  ;;  %412 = vmatprep.subr.mxu1 %v302_v45  ;;  %v407_v56 = vld [vmem:[%s672_s1] ss:$0 sm:$0xff]  ;;  %v284_v2 = vld [vmem:[#allocation9 + $0x60] sm:$0xff]  ;;  %v299_v3 = vld [vmem:[#allocation9 + $0xd8] sm:$0xff] }
  0x44   :  { %180 = vmatpush1.msra.mxu0 %v141_v23  ;;  %413 = vmatpush3.msra.mxu1 %v286_v46  ;;  %v283_v4 = vld [vmem:[#allocation9 + $0x58] sm:$0xff]  ;;  %v298_v5 = vld [vmem:[#allocation9 + $0xd0] sm:$0xff]  ;;  %v297_v7 = vld [vmem:[#allocation9 + $0xc8] sm:$0xff] }
  0x45   :  { %181 = vmatprep.subr.mxu0 %v140_v24  ;;  %414 = vmatprep.subr.mxu1 %v301_v47  ;;  %v282_v6 = vld [vmem:[#allocation9 + $0x50] sm:$0xff]  ;;  %v281_v8 = vld [vmem:[#allocation9 + $0x48] sm:$0xff]  ;;  %v296_v9 = vld [vmem:[#allocation9 + $0xc0] sm:$0xff] }
  0x46   :  { %182 = vmatpush1.msra.mxu0 %v139_v25  ;;  %415 = vmatpush3.msra.mxu1 %v285_v48  ;;  %v276_v18 = vld [vmem:[#allocation9 + $0x20] sm:$0xff]  ;;  %v291_v19 = vld [vmem:[#allocation9 + $0x98] sm:$0xff]  ;;  %v290_v21 = vld [vmem:[#allocation9 + $0x90] sm:$0xff] }
  0x47   :  { %183 = vmatprep.subr.mxu0 %v138_v26  ;;  %v275_v20 = vld [vmem:[#allocation9 + $0x18] sm:$0xff]  ;;  %v274_v22 = vld [vmem:[#allocation9 + $0x10] sm:$0xff]  ;;  %v289_v23 = vld [vmem:[#allocation9 + $0x88] sm:$0xff] }
  0x48   :  { %184 = vmatpush1.msra.mxu0 %v137_v27  ;;  %v273_v24 = vld [vmem:[#allocation9 + $0x8] sm:$0xff]  ;;  %v288_v25 = vld [vmem:[#allocation9 + $0x80] sm:$0xff]  ;;  %v157_v27 = vlaneseq }
  0x49   :  { %185 = vmatprep.subr.mxu0 %v136_v28  ;;  %v272_v26 = vld [vmem:[#allocation9] sm:$0xff] }
  0x4a   :  { %186 = vmatpush1.msra.mxu0 %v135_v29  ;;  %v158_v28 = vshrl.u32 %v157_v27, 7 }
  0x4b   :  { %187 = vmatprep.subr.mxu0 %v134_v30  ;;  %v155_v30 = vld [vmem:[%s675_s4] sm:$0x3] }
  0x4c   :  { %188 = vmatpush1.msra.mxu0 %v133_v32  ;;  %v159_v29 = vsub.s32 0, %v158_v28 }
  0x4d   :  { %189 = vmatprep.subr.mxu0 %v132_v33 }
  0x4e   :  { %190 = vmatpush1.msra.mxu0 %v131_v34  ;;  %v160_v32 = vrot.slane %v155_v30, %v159_v29 }
  0x4f   :  { %191 = vmatprep.subr.mxu0 %v130_v35 }
  0x50   :  { %192 = vmatpush1.msra.mxu0 %v129_v36 }
  0x51   :  { %193 = vmatprep.subr.mxu0 %v128_v37 }
  0x52   :  { %194 = vmatpush1.msra.mxu0 %v127_v38 }
  0x53   :  { %195 = vmatprep.subr.mxu0 %v126_v39 }
  0x54   :  { %196 = vmatpush1.msra.mxu0 %v125_v40 }
  0x55   :  { %197 = vmatprep.subr.mxu0 %v124_v41 }
  0x56   :  { %198 = vmatpush1.msra.mxu0 %v123_v42 }
  0xbf   :  { %v85_v10 = vpop.xlane.xlu0 %84 }
  0xc0   :  { %v89_v11 = vmul.f32 0.0078125, %v85_v10  ;;  %v280_v10 = vld [vmem:[#allocation9 + $0x40] sm:$0xff] }
  0xc2   :  { %v646_v12 = vsub.f32 %v80_v0, %v89_v11  ;;  %v295_v11 = vld [vmem:[#allocation9 + $0xb8] sm:$0xff] }
  0xc3   :  { %v87_v13 = vpop.xlane.xlu0 %86 }
  0xc4   :  { %v90_v14 = vmul.f32 0.0078125, %v87_v13  ;;  %v93_v15 = vmul.f32 %v646_v12, %v646_v12  ;;  %v294_v13 = vld [vmem:[#allocation9 + $0xb0] sm:$0xff] }
  0xc6   :  { %v650_v16 = vsub.f32 %v81_v1, %v90_v14  ;;  %95 = vadd.xlane.f32.xlu1 %v93_v15  ;;  %v300_v1 = vld [vmem:[#allocation9 + $0xe0] sm:$0xff]  ;;  %v278_v14 = vld [vmem:[#allocation9 + $0x30] sm:$0xff]  ;;  %v293_v15 = vld [vmem:[#allocation9 + $0xa8] sm:$0xff] }
  0xc7   :  { %416 = vmatprep.subr.mxu1 %v300_v1 }
  0xc8   :  { %v94_v17 = vmul.f32 %v650_v16, %v650_v16  ;;  %417 = vmatpush3.msra.mxu1 %v284_v2 }
  0xc9   :  { %418 = vmatprep.subr.mxu1 %v299_v3 }
  0xca   :  { %97 = vadd.xlane.f32.xlu1 %v94_v17  ;;  %419 = vmatpush3.msra.mxu1 %v283_v4  ;;  %v292_v17 = vld [vmem:[#allocation9 + $0xa0] sm:$0xff] }
  0xcb   :  { %420 = vmatprep.subr.mxu1 %v298_v5 }
  0xcc   :  { %421 = vmatpush3.msra.mxu1 %v282_v6 }
  0xcd   :  { %422 = vmatprep.subr.mxu1 %v297_v7 }
  0xce   :  { %423 = vmatpush3.msra.mxu1 %v281_v8 }
  0xcf   :  { %424 = vmatprep.subr.mxu1 %v296_v9 }
  0xd0   :  { %425 = vmatpush3.msra.mxu1 %v280_v10 }
  0xd1   :  { %426 = vmatprep.subr.mxu1 %v295_v11 }
 0x14f   :  { %v96_v49 = vpop.xlane.xlu1 %95 }
 0x150   :  { %v99_v50 = vmul.f32 0.0078125, %v96_v49 }
 0x152   :  { %v101_v51 = vadd.f32 1e-05, %v99_v50 }
 0x153   :  { %v98_v52 = vpop.xlane.xlu1 %97 }
 0x154   :  { %458 = vrsqrt.f32 %v101_v51  ;;  %v100_v53 = vmul.f32 0.0078125, %v98_v52 }
 0x156   :  { %v102_v54 = vadd.f32 1e-05, %v100_v53 }
 0x158   :  { %460 = vrsqrt.f32 %v102_v54 }
 0x161   :  { %v459_v55 = vpop.eup %458 }
 0x162   :  { %v105_v57 = vmul.f32 %v459_v55, %v646_v12  ;;  %v279_v12 = vld [vmem:[#allocation9 + $0x38] sm:$0xff] }
 0x163   :  { %427 = vmatpush3.msra.mxu1 %v279_v12 }
 0x164   :  { %v113_v59 = vmul.f32 %v407_v56, %v105_v57  ;;  %428 = vmatprep.subr.mxu1 %v294_v13 }
 0x165   :  { %v461_v60 = vpop.eup %460  ;;  %429 = vmatpush3.msra.mxu1 %v278_v14 }
 0x166   :  { %v121_v61 = vadd.f32 %v408_v58, %v113_v59  ;;  %v106_v62 = vmul.f32 %v461_v60, %v650_v16  ;;  %v277_v16 = vld [vmem:[#allocation9 + $0x28] sm:$0xff]  ;;  %430 = vmatprep.subr.mxu1 %v293_v15 }
 0x167   :  { %431 = vmatpush3.msra.mxu1 %v277_v16 }
 0x168   :  { %232 = vmatmul.mubr.f32.vlgmr.msra.gmra.mxu0 %v121_v61  ;;  %v114_v63 = vmul.f32 %v407_v56, %v106_v62  ;;  %432 = vmatprep.subr.mxu1 %v292_v17 }
 0x169   :  { %237 = vmatprep.mubr.f32.mxu0 %v586_v31  ;;  %433 = vmatpush3.msra.mxu1 %v276_v18  ;;  %v163_v31 = vsub.s32 1, %v158_v28 }
 0x16a   :  { %v122_v0 = vadd.f32 %v408_v58, %v114_v63  ;;  %434 = vmatprep.subr.mxu1 %v291_v19  ;;  %v409_v63 = vld [vmem:[%s677_s6] ss:$0 sm:$0xff] }
 0x16b   :  { %435 = vmatpush3.msra.mxu1 %v275_v20  ;;  %v164_v33 = vrot.slane %v155_v30, %v163_v31 }
 0x16c   :  { %238 = vmatmul.mubr.f32.gmra.mxu0 %v122_v0  ;;  %436 = vmatprep.subr.mxu1 %v290_v21 }
 0x16d   :  { %437 = vmatpush3.msra.mxu1 %v274_v22 }
 0x16e   :  { %438 = vmatprep.subr.mxu1 %v289_v23 }
 0x16f   :  { %439 = vmatpush3.msra.mxu1 %v273_v24 }
 0x170   :  { %440 = vmatprep.subr.mxu1 %v288_v25 }
 0x171   :  { %441 = vmatpush3.msra.mxu1 %v272_v26 }
 0x228   :  { %v233_v34 = vpop.f32.mrf.mxu0 }
 0x229   :  { %v234_v35 = vadd.f32 %v233_v34, %v160_v32 }
 0x22a   :  { %v235_v36 = vpop.f32.mrf.mxu0 }
 0x22b   :  { %v248_v37 = vmul.f32 0.70710677, %v234_v35  ;;  %v236_v38 = vadd.f32 %v235_v36, %v164_v33  ;;  %v244_v52 = vmul.f32 0.5, %v234_v35 }
 0x22c   :  { %v239_v39 = vpop.f32.mrf.mxu0 }
 0x22d   :  { %462 = verf.f32 %v248_v37  ;;  %v249_v40 = vmul.f32 0.70710677, %v236_v38  ;;  %v240_v41 = vadd.f32 %v239_v39, %v160_v32  ;;  %v245_v49 = vmul.f32 0.5, %v236_v38 }
 0x22e   :  { %v241_v42 = vpop.f32.mrf.mxu0 }
 0x22f   :  { %464 = verf.f32 %v249_v40  ;;  %v250_v43 = vmul.f32 0.70710677, %v240_v41  ;;  %v242_v44 = vadd.f32 %v241_v42, %v164_v33  ;;  %v246_v59 = vmul.f32 0.5, %v240_v41 }
 0x231   :  { %466 = verf.f32 %v250_v43  ;;  %v251_v45 = vmul.f32 0.70710677, %v242_v44  ;;  %v247_v57 = vmul.f32 0.5, %v242_v44 }
 0x233   :  { %468 = verf.f32 %v251_v45 }
 0x23a   :  { %v463_v46 = vpop.eup %462 }
 0x23b   :  { %v256_v48 = vadd.f32 1.0, %v463_v46 }
 0x23c   :  { %v465_v47 = vpop.eup %464 }
 0x23d   :  { %v257_v50 = vadd.f32 1.0, %v465_v47  ;;  %v260_v55 = vmul.f32 %v256_v48, %v244_v52 }
 0x23e   :  { %v467_v51 = vpop.eup %466 }
 0x23f   :  { %v261_v53 = vmul.f32 %v257_v50, %v245_v49  ;;  %v258_v56 = vadd.f32 1.0, %v467_v51 }
 0x240   :  { %v469_v54 = vpop.eup %468 }
 0x241   :  { %375 = vmatprep.mubr.f32.mxu1 %v261_v53  ;;  %v259_v58 = vadd.f32 1.0, %v469_v54  ;;  %v262_v61 = vmul.f32 %v258_v56, %v246_v59 }
 0x242   :  { %376 = vmatmul.mubr.f32.vlgmr.msra.gmra.mxu1 %v260_v55 }
 0x243   :  { %v263_v60 = vmul.f32 %v259_v58, %v247_v57 }
 0x245   :  { %380 = vmatprep.mubr.f32.mxu1 %v263_v60 }
 0x246   :  { %381 = vmatmul.mubr.f32.gmra.mxu1 %v262_v61 }
 0x302   :  { %v442_v62 = vpop.f32.mrf.mxu1 }
 0x304   :  { %v443_v0 = vpop.f32.mrf.mxu1 }
 0x305   :  { %v444_v1 = vadd.f32 %v443_v0, %v442_v62 }
 0x306   :  { %v445_v2 = vpop.f32.mrf.mxu1 }
 0x307   :  { %v378_v3 = vadd.f32 %v444_v1, %v409_v63 }
 0x308   :  { %v446_v4 = vpop.f32.mrf.mxu1 }
 0x309   :  { %386 = vst [vmem:[#allocation11] sm:$0xff] %v378_v3  ;;  %v447_v5 = vadd.f32 %v446_v4, %v445_v2 }
 0x30b   :  { %v383_v6 = vadd.f32 %v447_v5, %v409_v63 }
 0x30d   :  { %387 = vst [vmem:[#allocation11 + $0x8] sm:$0xff] %v383_v6 }
 0x30e   :  { %561 = shalt.err (!%p558_p10)
}
 0x30f   :  { %399 = dma.vmem_to_hbm [thread:$0]  %s394_s27, 256, %s678_s7, [#allocation5], %s580_s10, %s580_s10, %s581_s11  }
 0x310   :  { %576 = dma.done.wait [#allocation5], 256  }
 0x311   :  { %577 = vsyncadd [#allocation5], 4294967040 }
 0x312   :  { %403 = vsyncpa [#allocation4], 1 }
 0x313   :  { %404 = vsyncpa [#allocation7], 1 }
 0x314   :  { %405 = vsyncpa [#allocation10], 1 }
 0x315   :  { %406 = vsyncpa [#allocation5], 1 }

</bundles_post_ra>
